<compile_context>
chip_gen: v7x
topology: tpu7x:2x2x1
jax: 0.10.0
libtpu: 0.0.40
codegen_flags: <defaults>
</compile_context>

<pallas_src>
import numpy as np

import jax
import jax.numpy as jnp
from jax.experimental import pallas as pl
from jax.experimental.pallas import tpu as pltpu

COMPUTE_DTYPE = jnp.bfloat16   # MXU-native operands; accumulation stays f32.
LANE = 128


# ----------------------------------------------------------------------------
# Static helpers (prepare-time only, never in the hot path)
# ----------------------------------------------------------------------------
def _conv_out(n, stride):
    # Conv2d(kernel=3, padding=1) output size.
    return (n + 2 - 3) // stride + 1


def _lane_pad(n):
    return max(LANE, ((n + LANE - 1) // LANE) * LANE)


def _conv_as_dense(w, b, h, w_in, stride):
    """Fold Conv2d(k=3, pad=1, stride) into a dense per-image operator.

    Returns (K, b_flat, Ho, Wo) with
      K[c*H*W + ih*W + iw, n*Ho*Wo + oh*Wo + ow] = w[n, c, kh, kw]
    so that conv(x)  ==  x.reshape(C*H*W) @ K + b_flat   (NCHW flat order on
    both sides -- the same order PyTorch's Flatten uses).
    """
    w = np.asarray(w, np.float32)
    cout, cin, _, _ = w.shape
    ho, wo = _conv_out(h, stride), _conv_out(w_in, stride)
    dense = np.zeros((cin * h * w_in, cout * ho * wo), np.float32)
    rows = np.arange(cin) * (h * w_in)
    cols = np.arange(cout) * (ho * wo)
    for oh in range(ho):
        for ow in range(wo):
            o_idx = oh * wo + ow
            for kh in range(3):
                ih = stride * oh + kh - 1
                if ih < 0 or ih >= h:
                    continue
                for kw in range(3):
                    iw = stride * ow + kw - 1
                    if iw < 0 or iw >= w_in:
                        continue
                    i_idx = ih * w_in + iw
                    dense[np.ix_(rows + i_idx, cols + o_idx)] += w[:, :, kh, kw].T
    b_flat = np.repeat(np.asarray(b, np.float32), ho * wo)
    return dense, b_flat, ho, wo


# ----------------------------------------------------------------------------
# Parameter init (deterministic, PyTorch-shaped weights)
# ----------------------------------------------------------------------------
def init_dqn_params(key, input_size, n_actions):
    if len(input_size) in (2, 3):
        channels = 1 if len(input_size) == 2 else input_size[0]
        h, w = input_size[-2], input_size[-1]
        x = (h + 1 // 2 + 1) // 2                 # verbatim from the module
        y = ((w + 1) // 2 + 1) // 2
        specs = [
            ("conv1", (32, channels, 3, 3), (32,)),
            ("conv2", (64, 32, 3, 3), (64,)),
            ("conv3", (64, 64, 3, 3), (64,)),
            ("fc1", (512, x * y * 64), (512,)),
            ("fc2", (n_actions, 512), (n_actions,)),
        ]
    elif len(input_size) == 1:
        d = input_size[0]
        specs = [
            ("fc1", (128, d), (128,)),
            ("fc2", (128, 128), (128,)),
            ("fc3", (n_actions, 128), (n_actions,)),
        ]
    else:
        raise ValueError(input_size)
    params = {}
    for name, wshape, bshape in specs:
        key, k1, k2 = jax.random.split(key, 3)
        params[name + "_w"] = 0.05 * jax.random.normal(k1, wshape, jnp.float32)
        params[name + "_b"] = 0.05 * jax.random.normal(k2, bshape, jnp.float32)
    return params


# ----------------------------------------------------------------------------
# One-time weight preparation (kernel-ready layout)
# ----------------------------------------------------------------------------
def prepare_conv_branch(params, input_size, n_actions):
    channels = 1 if len(input_size) == 2 else input_size[0]
    h, w = input_size[-2], input_size[-1]

    k1, b1, h1, w1 = _conv_as_dense(params["conv1_w"], params["conv1_b"], h, w, 2)
    k2, b2, h2, w2 = _conv_as_dense(params["conv2_w"], params["conv2_b"], h1, w1, 2)
    k3, b3, h3, w3 = _conv_as_dense(params["conv3_w"], params["conv3_b"], h2, w2, 1)

    xq = (h + 1 // 2 + 1) // 2                    # verbatim PyTorch quirk
    yq = ((w + 1) // 2 + 1) // 2
    assert xq * yq == h3 * w3, \
        "module's Flatten size only matches the conv output for h <= 2"

    n_pad = _lane_pad(n_actions)

    wf1 = np.asarray(params["fc1_w"], np.float32).T      # (64*H3*W3, 512); NCHW order matches
    bf1 = np.asarray(params["fc1_b"], np.float32)
    assert wf1.shape[0] == k3.shape[1]

    wf2 = np.zeros((512, n_pad), np.float32)
    wf2[:, :n_actions] = np.asarray(params["fc2_w"], np.float32).T
    bf2 = np.zeros((n_pad,), np.float32)
    bf2[:n_actions] = np.asarray(params["fc2_b"], np.float32)

    layers = [(k1, b1), (k2, b2), (k3, b3), (wf1, bf1), (wf2, bf2)]
    layers = [(jnp.asarray(wm, COMPUTE_DTYPE),
               jnp.asarray(bm, jnp.float32).reshape(1, -1)) for wm, bm in layers]
    return dict(layers=layers, in_dim=channels * h * w, n_pad=n_pad)


def prepare_mlp_branch(params, input_size, n_actions):
    n_pad = _lane_pad(n_actions)
    w3 = np.zeros((128, n_pad), np.float32)
    w3[:, :n_actions] = np.asarray(params["fc3_w"], np.float32).T
    b3 = np.zeros((n_pad,), np.float32)
    b3[:n_actions] = np.asarray(params["fc3_b"], np.float32)
    layers = [
        (np.asarray(params["fc1_w"], np.float32).T, np.asarray(params["fc1_b"], np.float32)),
        (np.asarray(params["fc2_w"], np.float32).T, np.asarray(params["fc2_b"], np.float32)),
        (w3, b3),
    ]
    layers = [(jnp.asarray(wm, COMPUTE_DTYPE),
               jnp.asarray(bm, jnp.float32).reshape(1, -1)) for wm, bm in layers]
    return dict(layers=layers, in_dim=input_size[0], n_pad=n_pad)


# ----------------------------------------------------------------------------
# Fused Pallas kernel: N x (matmul + bias [+ ReLU]) on one batch tile
# ----------------------------------------------------------------------------
def _make_fused_mlp_kernel(n_layers):
    def kernel(*refs):
        x_ref, o_ref = refs[0], refs[-1]
        h = x_ref[...]                                            # (bt, Din) bf16
        for i in range(n_layers):
            w_ref = refs[1 + 2 * i]
            b_ref = refs[2 + 2 * i]
            acc = jnp.dot(h, w_ref[...], preferred_element_type=jnp.float32)
            acc = acc + b_ref[...]                                # f32 bias add
            if i + 1 < n_layers:
                h = jnp.maximum(acc, 0.0).astype(COMPUTE_DTYPE)   # f32 ReLU -> bf16
            else:
                o_ref[...] = acc.astype(o_ref.dtype)              # lane-dense store
    return kernel


def dqn_forward(kp, x, n_actions, *, block_rows=8):
    """Single fused pallas_call; grid = batch tiles (parallel), weights resident."""
    layers = kp["layers"]
    n_pad = kp["n_pad"]
    b = x.shape[0]
    xm = x.reshape(b, -1).astype(COMPUTE_DTYPE)                   # raw NCHW flatten
    assert xm.shape[1] == kp["in_dim"]

    bt = block_rows
    bp = ((b + bt - 1) // bt) * bt
    if bp != b:
        xm = jnp.pad(xm, ((0, bp - b), (0, 0)))
    din = xm.shape[1]

    in_specs = [pl.BlockSpec((bt, din), lambda i: (i, 0))]        # tiled activations
    args = [xm]
    for wm, bm in layers:                                         # resident weights
        in_specs.append(pl.BlockSpec(wm.shape, lambda i: (0, 0)))
        in_specs.append(pl.BlockSpec(bm.shape, lambda i: (0, 0)))
        args.extend([wm, bm])

    flops = 2 * bp * sum(int(wm.shape[0]) * int(wm.shape[1]) for wm, _ in layers)
    bytes_accessed = int(xm.size * xm.dtype.itemsize
                         + sum(wm.size * wm.dtype.itemsize + bm.size * bm.dtype.itemsize
                               for wm, bm in layers)
                         + bp * n_pad * 4)

    out = pl.pallas_call(
        _make_fused_mlp_kernel(len(layers)),
        out_shape=jax.ShapeDtypeStruct((bp, n_pad), jnp.float32),
        grid=(bp // bt,),
        in_specs=in_specs,
        out_specs=pl.BlockSpec((bt, n_pad), lambda i: (i, 0)),
        compiler_params=pltpu.CompilerParams(
            dimension_semantics=("parallel",),
            vmem_limit_bytes=32 * 1024 * 1024),
        cost_estimate=pl.CostEstimate(flops=int(flops), transcendentals=0,
                                      bytes_accessed=bytes_accessed),
    )(*args)
    return out[:b, :n_actions]


# ----------------------------------------------------------------------------
# Pure-JAX f32 reference (correctness check only)
# ----------------------------------------------------------------------------
def dqn_reference(params, x, input_size):
    if len(input_size) == 2:
        x = x[:, None, :, :]
    if len(input_size) in (2, 3):
        def conv(z, w, bias, s):
            y = jax.lax.conv_general_dilated(
                z, w, (s, s), ((1, 1), (1, 1)),
                dimension_numbers=("NCHW", "OIHW", "NCHW"))
            return jax.nn.relu(y + bias[None, :, None, None])
        x = conv(x, params["conv1_w"], params["conv1_b"], 2)
        x = conv(x, params["conv2_w"], params["conv2_b"], 2)
        x = conv(x, params["conv3_w"], params["conv3_b"], 1)
        x = x.reshape(x.shape[0], -1)
        x = jax.nn.relu(x @ params["fc1_w"].T + params["fc1_b"])
        return x @ params["fc2_w"].T + params["fc2_b"]
    x = jax.nn.relu(x @ params["fc1_w"].T + params["fc1_b"])
    x = jax.nn.relu(x @ params["fc2_w"].T + params["fc2_b"])
    return x @ params["fc3_w"].T + params["fc3_b"]


if __name__ == "__main__":
    key = jax.random.PRNGKey(0)

    # --- conv (image) branch: input_size = (C, H, W) with H <= 2 (module quirk) ---
    input_size = (4, 2, 16)
    n_actions = 6
    batch = 16                              # 2 grid steps of 8 rows (full sublanes)
    kkey, kx, key = jax.random.split(key, 3)
    params = init_dqn_params(kkey, input_size, n_actions)
    kparams = prepare_conv_branch(params, input_size, n_actions)
    x = jax.random.normal(kx, (batch,) + input_size, jnp.float32)        # NCHW
    conv_fwd = jax.jit(lambda xx: dqn_forward(kparams, xx, n_actions, block_rows=8))
    out = jax.block_until_ready(conv_fwd(x))
    ref = dqn_reference(params, x, input_size)
    assert out.shape == (batch, n_actions), out.shape
    # tolerance accounts for bf16 operand rounding (accumulation is f32)
    assert jnp.allclose(out, ref, rtol=2e-2, atol=1e-2), \
        float(jnp.max(jnp.abs(out - ref)))

    # --- MLP (vector) branch: input_size = (D,) ---
    input_size2 = (32,)
    n_actions2 = 4
    kkey2, kx2 = jax.random.split(key)
    params2 = init_dqn_params(kkey2, input_size2, n_actions2)
    kparams2 = prepare_mlp_branch(params2, input_size2, n_actions2)
    x2 = jax.random.normal(kx2, (8, input_size2[0]), jnp.float32)
    mlp_fwd = jax.jit(lambda xx: dqn_forward(kparams2, xx, n_actions2, block_rows=8))
    out2 = jax.block_until_ready(mlp_fwd(x2))
    ref2 = dqn_reference(params2, x2, input_size2)
    assert out2.shape == (8, n_actions2), out2.shape
    assert jnp.allclose(out2, ref2, rtol=2e-2, atol=1e-2), \
        float(jnp.max(jnp.abs(out2 - ref2)))

    print("KERNEL_OK")
</pallas_src>

<mosaic_0001>
module attributes {stable_mosaic.version = 11 : i64} {
  func.func @kernel(%arg0: i32, %arg1: memref<8x128xbf16, #tpu.memory_space<vmem>>, %arg2: memref<128x256xbf16, #tpu.memory_space<vmem>>, %arg3: memref<1x256xf32, #tpu.memory_space<vmem>>, %arg4: memref<256x256xbf16, #tpu.memory_space<vmem>>, %arg5: memref<1x256xf32, #tpu.memory_space<vmem>>, %arg6: memref<256x256xbf16, #tpu.memory_space<vmem>>, %arg7: memref<1x256xf32, #tpu.memory_space<vmem>>, %arg8: memref<256x512xbf16, #tpu.memory_space<vmem>>, %arg9: memref<1x512xf32, #tpu.memory_space<vmem>>, %arg10: memref<512x128xbf16, #tpu.memory_space<vmem>>, %arg11: memref<1x128xf32, #tpu.memory_space<vmem>>, %arg12: memref<8x128xf32, #tpu.memory_space<vmem>>) attributes {dimension_semantics = [#tpu.dimension_semantics<parallel>], iteration_bounds = array<i64: 2>, scalar_prefetch = 0 : i64, scratch_operands = 0 : i64, tpu.core_type = #tpu.core_type<tc>, window_params = [{transform_indices = @transform_0, window_bounds = array<i64: 8, 128>}, {pipeline_mode = #tpu.pipeline_mode<synchronous>, transform_indices = @transform_1, window_bounds = array<i64: 128, 256>}, {pipeline_mode = #tpu.pipeline_mode<synchronous>, transform_indices = @transform_2, window_bounds = array<i64: 1, 256>}, {pipeline_mode = #tpu.pipeline_mode<synchronous>, transform_indices = @transform_3, window_bounds = array<i64: 256, 256>}, {pipeline_mode = #tpu.pipeline_mode<synchronous>, transform_indices = @transform_4, window_bounds = array<i64: 1, 256>}, {pipeline_mode = #tpu.pipeline_mode<synchronous>, transform_indices = @transform_5, window_bounds = array<i64: 256, 256>}, {pipeline_mode = #tpu.pipeline_mode<synchronous>, transform_indices = @transform_6, window_bounds = array<i64: 1, 256>}, {pipeline_mode = #tpu.pipeline_mode<synchronous>, transform_indices = @transform_7, window_bounds = array<i64: 256, 512>}, {pipeline_mode = #tpu.pipeline_mode<synchronous>, transform_indices = @transform_8, window_bounds = array<i64: 1, 512>}, {pipeline_mode = #tpu.pipeline_mode<synchronous>, transform_indices = @transform_9, window_bounds = array<i64: 512, 128>}, {pipeline_mode = #tpu.pipeline_mode<synchronous>, transform_indices = @transform_10, window_bounds = array<i64: 1, 128>}, {transform_indices = @transform_11, window_bounds = array<i64: 8, 128>}]} {
    %c0 = arith.constant 0 : index
    %c0_0 = arith.constant 0 : index
    %0 = vector.load %arg1[%c0, %c0_0] : memref<8x128xbf16, #tpu.memory_space<vmem>>, vector<8x128xbf16>
    %c0_1 = arith.constant 0 : index
    %c0_2 = arith.constant 0 : index
    %1 = vector.load %arg2[%c0_1, %c0_2] : memref<128x256xbf16, #tpu.memory_space<vmem>>, vector<128x256xbf16>
    %cst = arith.constant dense<0.000000e+00> : vector<8x256xf32>
    %2 = tpu.matmul %0, %1, %cst {dimension_numbers = #tpu.dot_dimension_numbers<[1], [0], [0], [1], [0, 0, 1, 1], [], []>} : vector<8x128xbf16>, vector<128x256xbf16>, vector<8x256xf32> -> vector<8x256xf32>
    %c0_3 = arith.constant 0 : index
    %c0_4 = arith.constant 0 : index
    %3 = vector.load %arg3[%c0_3, %c0_4] : memref<1x256xf32, #tpu.memory_space<vmem>>, vector<1x256xf32>
    %4 = vector.broadcast %3 : vector<1x256xf32> to vector<8x256xf32>
    %5 = arith.addf %2, %4 : vector<8x256xf32>
    %cst_5 = arith.constant 0.000000e+00 : f32
    %6 = vector.broadcast %cst_5 : f32 to vector<8x256xf32>
    %7 = arith.maximumf %5, %6 : vector<8x256xf32>
    %8 = arith.truncf %7 : vector<8x256xf32> to vector<8x256xbf16>
    %c0_6 = arith.constant 0 : index
    %c0_7 = arith.constant 0 : index
    %9 = vector.load %arg4[%c0_6, %c0_7] : memref<256x256xbf16, #tpu.memory_space<vmem>>, vector<256x256xbf16>
    %cst_8 = arith.constant dense<0.000000e+00> : vector<8x256xf32>
    %10 = tpu.matmul %8, %9, %cst_8 {dimension_numbers = #tpu.dot_dimension_numbers<[1], [0], [0], [1], [0, 0, 1, 1], [], []>} : vector<8x256xbf16>, vector<256x256xbf16>, vector<8x256xf32> -> vector<8x256xf32>
    %c0_9 = arith.constant 0 : index
    %c0_10 = arith.constant 0 : index
    %11 = vector.load %arg5[%c0_9, %c0_10] : memref<1x256xf32, #tpu.memory_space<vmem>>, vector<1x256xf32>
    %12 = vector.broadcast %11 : vector<1x256xf32> to vector<8x256xf32>
    %13 = arith.addf %10, %12 : vector<8x256xf32>
    %cst_11 = arith.constant 0.000000e+00 : f32
    %14 = vector.broadcast %cst_11 : f32 to vector<8x256xf32>
    %15 = arith.maximumf %13, %14 : vector<8x256xf32>
    %16 = arith.truncf %15 : vector<8x256xf32> to vector<8x256xbf16>
    %c0_12 = arith.constant 0 : index
    %c0_13 = arith.constant 0 : index
    %17 = vector.load %arg6[%c0_12, %c0_13] : memref<256x256xbf16, #tpu.memory_space<vmem>>, vector<256x256xbf16>
    %cst_14 = arith.constant dense<0.000000e+00> : vector<8x256xf32>
    %18 = tpu.matmul %16, %17, %cst_14 {dimension_numbers = #tpu.dot_dimension_numbers<[1], [0], [0], [1], [0, 0, 1, 1], [], []>} : vector<8x256xbf16>, vector<256x256xbf16>, vector<8x256xf32> -> vector<8x256xf32>
    %c0_15 = arith.constant 0 : index
    %c0_16 = arith.constant 0 : index
    %19 = vector.load %arg7[%c0_15, %c0_16] : memref<1x256xf32, #tpu.memory_space<vmem>>, vector<1x256xf32>
    %20 = vector.broadcast %19 : vector<1x256xf32> to vector<8x256xf32>
    %21 = arith.addf %18, %20 : vector<8x256xf32>
    %cst_17 = arith.constant 0.000000e+00 : f32
    %22 = vector.broadcast %cst_17 : f32 to vector<8x256xf32>
    %23 = arith.maximumf %21, %22 : vector<8x256xf32>
    %24 = arith.truncf %23 : vector<8x256xf32> to vector<8x256xbf16>
    %c0_18 = arith.constant 0 : index
    %c0_19 = arith.constant 0 : index
    %25 = vector.load %arg8[%c0_18, %c0_19] : memref<256x512xbf16, #tpu.memory_space<vmem>>, vector<256x512xbf16>
    %cst_20 = arith.constant dense<0.000000e+00> : vector<8x512xf32>
    %26 = tpu.matmul %24, %25, %cst_20 {dimension_numbers = #tpu.dot_dimension_numbers<[1], [0], [0], [1], [0, 0, 1, 1], [], []>} : vector<8x256xbf16>, vector<256x512xbf16>, vector<8x512xf32> -> vector<8x512xf32>
    %c0_21 = arith.constant 0 : index
    %c0_22 = arith.constant 0 : index
    %27 = vector.load %arg9[%c0_21, %c0_22] : memref<1x512xf32, #tpu.memory_space<vmem>>, vector<1x512xf32>
    %28 = vector.broadcast %27 : vector<1x512xf32> to vector<8x512xf32>
    %29 = arith.addf %26, %28 : vector<8x512xf32>
    %cst_23 = arith.constant 0.000000e+00 : f32
    %30 = vector.broadcast %cst_23 : f32 to vector<8x512xf32>
    %31 = arith.maximumf %29, %30 : vector<8x512xf32>
    %32 = arith.truncf %31 : vector<8x512xf32> to vector<8x512xbf16>
    %c0_24 = arith.constant 0 : index
    %c0_25 = arith.constant 0 : index
    %33 = vector.load %arg10[%c0_24, %c0_25] : memref<512x128xbf16, #tpu.memory_space<vmem>>, vector<512x128xbf16>
    %cst_26 = arith.constant dense<0.000000e+00> : vector<8x128xf32>
    %34 = tpu.matmul %32, %33, %cst_26 {dimension_numbers = #tpu.dot_dimension_numbers<[1], [0], [0], [1], [0, 0, 1, 1], [], []>} : vector<8x512xbf16>, vector<512x128xbf16>, vector<8x128xf32> -> vector<8x128xf32>
    %c0_27 = arith.constant 0 : index
    %c0_28 = arith.constant 0 : index
    %35 = vector.load %arg11[%c0_27, %c0_28] : memref<1x128xf32, #tpu.memory_space<vmem>>, vector<1x128xf32>
    %36 = vector.broadcast %35 : vector<1x128xf32> to vector<8x128xf32>
    %37 = arith.addf %34, %36 : vector<8x128xf32>
    %c0_29 = arith.constant 0 : index
    %c0_30 = arith.constant 0 : index
    %38 = vector.load %arg12[%c0_29, %c0_30] : memref<8x128xf32, #tpu.memory_space<vmem>>, vector<8x128xf32>
    tpu.vector_store %arg12[%c0_29, %c0_30], %37 {strides = array<i32>} : memref<8x128xf32, #tpu.memory_space<vmem>>, vector<8x128xf32>,
    return
  }
  func.func @transform_0(%arg0: i32) -> (i32, i32) {
    %c0_i32 = arith.constant 0 : i32
    %c0_i32_0 = arith.constant 0 : i32
    return %arg0, %c0_i32 : i32, i32
  }
  func.func @transform_1(%arg0: i32) -> (i32, i32) {
    %c0_i32 = arith.constant 0 : i32
    %c0_i32_0 = arith.constant 0 : i32
    %c0_i32_1 = arith.constant 0 : i32
    return %c0_i32, %c0_i32_0 : i32, i32
  }
  func.func @transform_2(%arg0: i32) -> (i32, i32) {
    %c0_i32 = arith.constant 0 : i32
    %c0_i32_0 = arith.constant 0 : i32
    %c0_i32_1 = arith.constant 0 : i32
    return %c0_i32, %c0_i32_0 : i32, i32
  }
  func.func @transform_3(%arg0: i32) -> (i32, i32) {
    %c0_i32 = arith.constant 0 : i32
    %c0_i32_0 = arith.constant 0 : i32
    %c0_i32_1 = arith.constant 0 : i32
    return %c0_i32, %c0_i32_0 : i32, i32
  }
  func.func @transform_4(%arg0: i32) -> (i32, i32) {
    %c0_i32 = arith.constant 0 : i32
    %c0_i32_0 = arith.constant 0 : i32
    %c0_i32_1 = arith.constant 0 : i32
    return %c0_i32, %c0_i32_0 : i32, i32
  }
  func.func @transform_5(%arg0: i32) -> (i32, i32) {
    %c0_i32 = arith.constant 0 : i32
    %c0_i32_0 = arith.constant 0 : i32
    %c0_i32_1 = arith.constant 0 : i32
    return %c0_i32, %c0_i32_0 : i32, i32
  }
  func.func @transform_6(%arg0: i32) -> (i32, i32) {
    %c0_i32 = arith.constant 0 : i32
    %c0_i32_0 = arith.constant 0 : i32
    %c0_i32_1 = arith.constant 0 : i32
    return %c0_i32, %c0_i32_0 : i32, i32
  }
  func.func @transform_7(%arg0: i32) -> (i32, i32) {
    %c0_i32 = arith.constant 0 : i32
    %c0_i32_0 = arith.constant 0 : i32
    %c0_i32_1 = arith.constant 0 : i32
    return %c0_i32, %c0_i32_0 : i32, i32
  }
  func.func @transform_8(%arg0: i32) -> (i32, i32) {
    %c0_i32 = arith.constant 0 : i32
    %c0_i32_0 = arith.constant 0 : i32
    %c0_i32_1 = arith.constant 0 : i32
    return %c0_i32, %c0_i32_0 : i32, i32
  }
  func.func @transform_9(%arg0: i32) -> (i32, i32) {
    %c0_i32 = arith.constant 0 : i32
    %c0_i32_0 = arith.constant 0 : i32
    %c0_i32_1 = arith.constant 0 : i32
    return %c0_i32, %c0_i32_0 : i32, i32
  }
  func.func @transform_10(%arg0: i32) -> (i32, i32) {
    %c0_i32 = arith.constant 0 : i32
    %c0_i32_0 = arith.constant 0 : i32
    %c0_i32_1 = arith.constant 0 : i32
    return %c0_i32, %c0_i32_0 : i32, i32
  }
  func.func @transform_11(%arg0: i32) -> (i32, i32) {
    %c0_i32 = arith.constant 0 : i32
    %c0_i32_0 = arith.constant 0 : i32
    return %arg0, %c0_i32 : i32, i32
  }
}

</mosaic_0001>

<bundles_post_ra>
// kernel: _lambda_.1
= control target key start
LH: loop header
LB: loop body
LE: loop exit
PB: predicated region body
PF: predicated region fallthrough
CT: control target
= control target key end

     0   :  { %s2484_s17 = smov 0   ;;  %s3070_s0 = inlined_call_operand.vmem [shape: bf16[16,128], index: 0, kind: input, shape index: {}]   ;;  %s3071_s1 = inlined_call_operand.vmem [shape: bf16[128,256], index: 1, kind: input, shape index: {}]   ;;  %s3072_s2 = inlined_call_operand.vmem [shape: f32[1,256], index: 2, kind: input, shape index: {}]   ;;  %s3073_s3 = inlined_call_operand.vmem [shape: bf16[256,256], index: 3, kind: input, shape index: {}]   ;;  %s3074_s4 = inlined_call_operand.vmem [shape: f32[1,256], index: 4, kind: input, shape index: {}]   ;;  %s3075_s5 = inlined_call_operand.vmem [shape: bf16[256,256], index: 5, kind: input, shape index: {}]   ;;  %s3076_s6 = inlined_call_operand.vmem [shape: f32[1,256], index: 6, kind: input, shape index: {}]   ;;  %s3077_s7 = inlined_call_operand.vmem [shape: bf16[256,512], index: 7, kind: input, shape index: {}]   ;;  %s3078_s8 = inlined_call_operand.vmem [shape: f32[1,512], index: 8, kind: input, shape index: {}]   ;;  %s3079_s9 = inlined_call_operand.vmem [shape: bf16[512,128], index: 9, kind: input, shape index: {}]   ;;  %s3080_s10 = inlined_call_operand.vmem [shape: f32[1,128], index: 10, kind: input, shape index: {}]   ;;  %s3081_s11 = inlined_call_operand.vmem [shape: f32[16,128], index: 11, kind: output, shape index: {}]  }
   0x1 LB: > { %s1928_s18 = sadd.s32 4294967295, %s2421_s17   ;;  %p1932_p0 = scmp.ge.s32.totalorder %s2421_s17, 1  ;;  %s2421_s17 = sphi %s2484_s17, %s21_s17  }
   0x2   : > { %p336_p1 = scmp.lt.s32.totalorder %s2421_s17, 3 }
   0x4   : > { %p337_p2 = pnand %p1932_p0, %p336_p1 }
   0x5   : > { %v2167_v0 = vld [vmem:[%s3071_s1 + $0x4] ss:$8 sps:$4 sm:$0xff] (!%p337_p2)   ;;  %v2169_v1 = vld [vmem:[%s3071_s1] ss:$8 sps:$4 sm:$0xff] (!%p337_p2)   ;;  %v2423_v2 = vmov (!%p337_p2), 0   ;;  %p374_p3 = scmp.lt.s32.totalorder (!%p337_p2), %s1928_s18, 1 }
   0x6   : > { %340 = sbr.rel (%p337_p2) target bundleno = 1138 (0x472), region = 64  ;;  %524 = vmatprep.mubr.bf16.mxu0 (!%p337_p2), %v2423_v2  ;;  %492 = vmatprep.subr.bf16.mxu0 (!%p337_p2), %v2167_v0  ;;  %v2170_v3 = vld [vmem:[%s3071_s1 + $0x14] ss:$8 sps:$4 sm:$0xff] (!%p337_p2)   ;;  %v2172_v4 = vld [vmem:[%s3071_s1 + $0x10] ss:$8 sps:$4 sm:$0xff] (!%p337_p2)  }
   0x7   : > { %493 = vmatpush1.bf16.msra.mxu0 (!%p337_p2), %v2169_v1  ;;  %v2173_v5 = vld [vmem:[%s3071_s1 + $0x24] ss:$8 sps:$4 sm:$0xff] (!%p337_p2)   ;;  %v2175_v6 = vld [vmem:[%s3071_s1 + $0x20] ss:$8 sps:$4 sm:$0xff] (!%p337_p2)   ;;  %v2176_v7 = vld [vmem:[%s3071_s1 + $0x34] ss:$8 sps:$4 sm:$0xff] (!%p337_p2)  }
   0x8   : > { %494 = vmatprep.subr.bf16.mxu0 (!%p337_p2), %v2170_v3  ;;  %v2178_v8 = vld [vmem:[%s3071_s1 + $0x30] ss:$8 sps:$4 sm:$0xff] (!%p337_p2)   ;;  %v2179_v9 = vld [vmem:[%s3071_s1 + $0x44] ss:$8 sps:$4 sm:$0xff] (!%p337_p2)   ;;  %v2193_v11 = vld [vmem:[%s3073_s3] ss:$8 sps:$4 sm:$0xff] (!%p337_p2)  }
   0x9   : > { %v2191_v10 = vld [vmem:[%s3073_s3 + $0x4] ss:$8 sps:$4 sm:$0xff] (!%p337_p2)   ;;  %v2194_v12 = vld [vmem:[%s3073_s3 + $0x14] ss:$8 sps:$4 sm:$0xff] (!%p337_p2)   ;;  %v2181_v13 = vld [vmem:[%s3071_s1 + $0x40] ss:$8 sps:$4 sm:$0xff] (!%p337_p2)  }
   0xa   : > { %741 = vmatprep.subr.bf16.mxu1 (!%p337_p2), %v2191_v10  ;;  %v2196_v14 = vld [vmem:[%s3073_s3 + $0x10] ss:$8 sps:$4 sm:$0xff] (!%p337_p2)   ;;  %v2197_v15 = vld [vmem:[%s3073_s3 + $0x24] ss:$8 sps:$4 sm:$0xff] (!%p337_p2)   ;;  %v2182_v16 = vld [vmem:[%s3071_s1 + $0x54] ss:$8 sps:$4 sm:$0xff] (!%p337_p2)  }
   0xb   : > { %495 = vmatpush1.bf16.msra.mxu0 (!%p337_p2), %v2172_v4  ;;  %742 = vmatpush1.bf16.msra.mxu1 (!%p337_p2), %v2193_v11  ;;  %v2184_v17 = vld [vmem:[%s3071_s1 + $0x50] ss:$8 sps:$4 sm:$0xff] (!%p337_p2)   ;;  %v2199_v18 = vld [vmem:[%s3073_s3 + $0x20] ss:$8 sps:$4 sm:$0xff] (!%p337_p2)   ;;  %v2200_v19 = vld [vmem:[%s3073_s3 + $0x34] ss:$8 sps:$4 sm:$0xff] (!%p337_p2)  }
   0xc   : > { %496 = vmatprep.subr.bf16.mxu0 (!%p337_p2), %v2173_v5  ;;  %743 = vmatprep.subr.bf16.mxu1 (!%p337_p2), %v2194_v12  ;;  %v2185_v20 = vld [vmem:[%s3071_s1 + $0x64] ss:$8 sps:$4 sm:$0xff] (!%p337_p2)   ;;  %v2187_v21 = vld [vmem:[%s3071_s1 + $0x60] ss:$8 sps:$4 sm:$0xff] (!%p337_p2)   ;;  %v2202_v22 = vld [vmem:[%s3073_s3 + $0x30] ss:$8 sps:$4 sm:$0xff] (!%p337_p2)  }
   0xd   : > { %s3083_s18 = smov (!%p374_p3, %s1928_s18), 1  ;;  %v2203_v23 = vld [vmem:[%s3073_s3 + $0x44] ss:$8 sps:$4 sm:$0xff]   ;;  %v2188_v24 = vld [vmem:[%s3071_s1 + $0x74] ss:$8 sps:$4 sm:$0xff]  }
   0xe   : > { %s1933_s29 = sshll.u32 %s3083_s18, 2  ;;  %v2190_v25 = vld [vmem:[%s3071_s1 + $0x70] ss:$8 sps:$4 sm:$0xff]   ;;  %v2205_v26 = vld [vmem:[%s3073_s3 + $0x40] ss:$8 sps:$4 sm:$0xff]   ;;  %s1934_s28 = sshll.u32 %s3083_s18, 3 }
   0xf   : > { %497 = vmatpush1.bf16.msra.mxu0 %v2175_v6  ;;  %744 = vmatpush1.bf16.msra.mxu1 %v2196_v14  ;;  %s377_s21 = scalar_lea.vmem %s3070_s0, %s1933_s29  ;;  %v2206_v27 = vld [vmem:[%s3073_s3 + $0x54] ss:$8 sps:$4 sm:$0xff]   ;;  %v2208_v29 = vld [vmem:[%s3073_s3 + $0x50] ss:$8 sps:$4 sm:$0xff]   ;;  %v2209_v30 = vld [vmem:[%s3073_s3 + $0x64] ss:$8 sps:$4 sm:$0xff]   ;;  %v402_v14 = vlaneseq  ;;  %s381_s12 = scalar_lea.vmem %s3081_s11, %s1934_s28 }
  0x10   : > { %498 = vmatprep.subr.bf16.mxu0 %v2176_v7  ;;  %745 = vmatprep.subr.bf16.mxu1 %v2197_v15  ;;  %v383_v28 = vld [vmem:[%s377_s21] sm:$0xf]  ;;  %v2212_v32 = vld [vmem:[%s3073_s3 + $0x74] ss:$8 sps:$4 sm:$0xff]   ;;  %v2214_v33 = vld [vmem:[%s3073_s3 + $0x70] ss:$8 sps:$4 sm:$0xff]  }
  0x11   : > { %v2211_v31 = vld [vmem:[%s3073_s3 + $0x60] ss:$8 sps:$4 sm:$0xff]   ;;  %v2215_v34 = vld [vmem:[%s3073_s3 + $0x84] ss:$8 sps:$4 sm:$0xff]   ;;  %v2218_v36 = vld [vmem:[%s3073_s3 + $0x94] ss:$8 sps:$4 sm:$0xff]  }
  0x12   : > { %v2217_v35 = vld [vmem:[%s3073_s3 + $0x80] ss:$8 sps:$4 sm:$0xff]   ;;  %v2220_v37 = vld [vmem:[%s3073_s3 + $0x90] ss:$8 sps:$4 sm:$0xff]   ;;  %v2221_v38 = vld [vmem:[%s3073_s3 + $0xa4] ss:$8 sps:$4 sm:$0xff]  }
  0x13   : > { %499 = vmatpush1.bf16.msra.mxu0 %v2178_v8  ;;  %746 = vmatpush1.bf16.msra.mxu1 %v2199_v18  ;;  %v2223_v39 = vld [vmem:[%s3073_s3 + $0xa0] ss:$8 sps:$4 sm:$0xff]   ;;  %v2224_v40 = vld [vmem:[%s3073_s3 + $0xb4] ss:$8 sps:$4 sm:$0xff]   ;;  %v2226_v41 = vld [vmem:[%s3073_s3 + $0xb0] ss:$8 sps:$4 sm:$0xff]  }
  0x14   : > { %500 = vmatprep.subr.bf16.mxu0 %v2179_v9  ;;  %747 = vmatprep.subr.bf16.mxu1 %v2200_v19  ;;  %v2227_v42 = vld [vmem:[%s3073_s3 + $0xc4] ss:$8 sps:$4 sm:$0xff]   ;;  %v2229_v43 = vld [vmem:[%s3073_s3 + $0xc0] ss:$8 sps:$4 sm:$0xff]   ;;  %v2230_v44 = vld [vmem:[%s3073_s3 + $0xd4] ss:$8 sps:$4 sm:$0xff]  }
  0x15   : > { %v2232_v45 = vld [vmem:[%s3073_s3 + $0xd0] ss:$8 sps:$4 sm:$0xff]   ;;  %v2233_v46 = vld [vmem:[%s3073_s3 + $0xe4] ss:$8 sps:$4 sm:$0xff]   ;;  %v2235_v47 = vld [vmem:[%s3073_s3 + $0xe0] ss:$8 sps:$4 sm:$0xff]  }
  0x16   : > { %v2236_v48 = vld [vmem:[%s3073_s3 + $0xf4] ss:$8 sps:$4 sm:$0xff]   ;;  %v2238_v49 = vld [vmem:[%s3073_s3 + $0xf0] ss:$8 sps:$4 sm:$0xff]   ;;  %v2239_v50 = vld [vmem:[%s3075_s5] ss:$8 sps:$4 sm:$0xff]  }
  0x17   : > { %501 = vmatpush1.bf16.msra.mxu0 %v2181_v13  ;;  %748 = vmatpush1.bf16.msra.mxu1 %v2202_v22  ;;  %v2241_v51 = vld [vmem:[%s3075_s5 + $0x4] ss:$8 sps:$4 sm:$0xff]   ;;  %v2244_v52 = vld [vmem:[%s3075_s5 + $0x14] ss:$8 sps:$4 sm:$0xff]   ;;  %v2242_v53 = vld [vmem:[%s3075_s5 + $0x10] ss:$8 sps:$4 sm:$0xff]  }
  0x18   : > { %502 = vmatprep.subr.bf16.mxu0 %v2182_v16  ;;  %749 = vmatprep.subr.bf16.mxu1 %v2203_v23  ;;  %v2247_v54 = vld [vmem:[%s3075_s5 + $0x24] ss:$8 sps:$4 sm:$0xff]   ;;  %v2245_v55 = vld [vmem:[%s3075_s5 + $0x20] ss:$8 sps:$4 sm:$0xff]   ;;  %v2250_v56 = vld [vmem:[%s3075_s5 + $0x34] ss:$8 sps:$4 sm:$0xff]  }
  0x19   : > { %v2248_v57 = vld [vmem:[%s3075_s5 + $0x30] ss:$8 sps:$4 sm:$0xff]   ;;  %v2253_v58 = vld [vmem:[%s3075_s5 + $0x44] ss:$8 sps:$4 sm:$0xff]   ;;  %v2251_v59 = vld [vmem:[%s3075_s5 + $0x40] ss:$8 sps:$4 sm:$0xff]  }
  0x1a   : > { %v2256_v60 = vld [vmem:[%s3075_s5 + $0x54] ss:$8 sps:$4 sm:$0xff]   ;;  %v2254_v61 = vld [vmem:[%s3075_s5 + $0x50] ss:$8 sps:$4 sm:$0xff]   ;;  %v2259_v62 = vld [vmem:[%s3075_s5 + $0x64] ss:$8 sps:$4 sm:$0xff]  }
  0x1b   : > { %503 = vmatpush1.bf16.msra.mxu0 %v2184_v17  ;;  %750 = vmatpush1.bf16.msra.mxu1 %v2205_v26  ;;  %v2257_v63 = vld [vmem:[%s3075_s5 + $0x60] ss:$8 sps:$4 sm:$0xff]   ;;  %v2262_v0 = vld [vmem:[%s3075_s5 + $0x74] ss:$8 sps:$4 sm:$0xff]   ;;  %v2260_v1 = vld [vmem:[%s3075_s5 + $0x70] ss:$8 sps:$4 sm:$0xff]  }
  0x1c   : > { %504 = vmatprep.subr.bf16.mxu0 %v2185_v20  ;;  %751 = vmatprep.subr.bf16.mxu1 %v2206_v27  ;;  %v2265_v2 = vld [vmem:[%s3075_s5 + $0x84] ss:$8 sps:$4 sm:$0xff]   ;;  %v2263_v3 = vld [vmem:[%s3075_s5 + $0x80] ss:$8 sps:$4 sm:$0xff]   ;;  %v2268_v4 = vld [vmem:[%s3075_s5 + $0x94] ss:$8 sps:$4 sm:$0xff]  }
  0x1d   : > { %v2266_v5 = vld [vmem:[%s3075_s5 + $0x90] ss:$8 sps:$4 sm:$0xff]   ;;  %v2271_v6 = vld [vmem:[%s3075_s5 + $0xa4] ss:$8 sps:$4 sm:$0xff]   ;;  %v2269_v7 = vld [vmem:[%s3075_s5 + $0xa0] ss:$8 sps:$4 sm:$0xff]  }
  0x1e   : > { %v2274_v8 = vld [vmem:[%s3075_s5 + $0xb4] ss:$8 sps:$4 sm:$0xff]   ;;  %v2272_v9 = vld [vmem:[%s3075_s5 + $0xb0] ss:$8 sps:$4 sm:$0xff]   ;;  %v2277_v10 = vld [vmem:[%s3075_s5 + $0xc4] ss:$8 sps:$4 sm:$0xff]  }
  0x1f   : > { %505 = vmatpush1.bf16.msra.mxu0 %v2187_v21  ;;  %752 = vmatpush1.bf16.msra.mxu1 %v2208_v29  ;;  %v2275_v11 = vld [vmem:[%s3075_s5 + $0xc0] ss:$8 sps:$4 sm:$0xff]   ;;  %v2280_v12 = vld [vmem:[%s3075_s5 + $0xd4] ss:$8 sps:$4 sm:$0xff]   ;;  %v2278_v13 = vld [vmem:[%s3075_s5 + $0xd0] ss:$8 sps:$4 sm:$0xff]  }
  0x20   : > { %506 = vmatprep.subr.bf16.mxu0 %v2188_v24  ;;  %753 = vmatprep.subr.bf16.mxu1 %v2209_v30  ;;  %v2730_v15 = vshrl.u32 %v402_v14, 7  ;;  %v400_v17 = vld [vmem:[%s3072_s2] sm:$0x3]  ;;  %v2298_v14 = vld [vmem:[%s3077_s7 + $0x2c] ss:$16 sps:$4 sm:$0xff]  }
  0x22   : > { %v2733_v16 = vsub.s32 0, %v2730_v15  ;;  %v2739_v18 = vsub.s32 1, %v2730_v15 }
  0x23   : > { %507 = vmatpush1.bf16.msra.mxu0 %v2190_v25  ;;  %754 = vmatpush1.bf16.msra.mxu1 %v2211_v31  ;;  %v2283_v31 = vld [vmem:[%s3075_s5 + $0xe4] ss:$8 sps:$4 sm:$0xff]  }
  0x24   : > { %755 = vmatprep.subr.bf16.mxu1 %v2212_v32  ;;  %990 = vmatprep.subr.bf16.mxu0 %v2241_v51  ;;  %v405_v19 = vrot.slane %v400_v17, %v2733_v16  ;;  %v409_v20 = vrot.slane %v400_v17, %v2739_v18  ;;  %v2281_v32 = vld [vmem:[%s3075_s5 + $0xe0] ss:$8 sps:$4 sm:$0xff]  }
  0x25   : > { %v2329_v51 = vld [vmem:[%s3077_s7 + $0xe0] ss:$16 sps:$4 sm:$0xff]   ;;  %v2296_v17 = vld [vmem:[%s3077_s7 + $0x28] ss:$16 sps:$4 sm:$0xff]  }
  0x26   : > { %525 = vmatmul.mubr.bf16.vlgmr.msra.gmra.mrb[0].mxu0 %v383_v28 }
  0x27   : > { %756 = vmatpush1.bf16.msra.mxu1 %v2214_v33  ;;  %991 = vmatpush1.bf16.msra.mxu0 %v2239_v50  ;;  %v2286_v33 = vld [vmem:[%s3075_s5 + $0xf4] ss:$8 sps:$4 sm:$0xff]  }
  0x28   : > { %757 = vmatprep.subr.bf16.mxu1 %v2215_v34  ;;  %992 = vmatprep.subr.bf16.mxu0 %v2244_v52  ;;  %v2284_v34 = vld [vmem:[%s3075_s5 + $0xf0] ss:$8 sps:$4 sm:$0xff]   ;;  %v2331_v50 = vld [vmem:[%s3077_s7 + $0xe4] ss:$16 sps:$4 sm:$0xff]  }
  0x29   : > { %v2337_v52 = vld [vmem:[%s3077_s7 + $0x104] ss:$16 sps:$4 sm:$0xff]  }
  0x2b   : > { %758 = vmatpush1.bf16.msra.mxu1 %v2217_v35  ;;  %993 = vmatpush1.bf16.msra.mxu0 %v2242_v53  ;;  %v2287_v35 = vld [vmem:[%s3077_s7] ss:$16 sps:$4 sm:$0xff]  }
  0x2c   : > { %759 = vmatprep.subr.bf16.mxu1 %v2218_v36  ;;  %994 = vmatprep.subr.bf16.mxu0 %v2247_v54  ;;  %v2289_v36 = vld [vmem:[%s3077_s7 + $0x4] ss:$16 sps:$4 sm:$0xff]   ;;  %v2335_v53 = vld [vmem:[%s3077_s7 + $0x100] ss:$16 sps:$4 sm:$0xff]  }
  0x2d   : > { %v2343_v54 = vld [vmem:[%s3077_s7 + $0x124] ss:$16 sps:$4 sm:$0xff]  }
  0x2f   : > { %760 = vmatpush1.bf16.msra.mxu1 %v2220_v37  ;;  %995 = vmatpush1.bf16.msra.mxu0 %v2245_v55  ;;  %v2292_v37 = vld [vmem:[%s3077_s7 + $0xc] ss:$16 sps:$4 sm:$0xff]   ;;  %v2341_v55 = vld [vmem:[%s3077_s7 + $0x120] ss:$16 sps:$4 sm:$0xff]  }
  0x30   : > { %761 = vmatprep.subr.bf16.mxu1 %v2221_v38  ;;  %996 = vmatprep.subr.bf16.mxu0 %v2250_v56  ;;  %v2295_v38 = vld [vmem:[%s3077_s7 + $0x24] ss:$16 sps:$4 sm:$0xff]  }
  0x31   : > { %v2349_v56 = vld [vmem:[%s3077_s7 + $0x144] ss:$16 sps:$4 sm:$0xff]  }
  0x33   : > { %762 = vmatpush1.bf16.msra.mxu1 %v2223_v39  ;;  %997 = vmatpush1.bf16.msra.mxu0 %v2248_v57  ;;  %v2293_v39 = vld [vmem:[%s3077_s7 + $0x20] ss:$16 sps:$4 sm:$0xff]  }
  0x34   : > { %763 = vmatprep.subr.bf16.mxu1 %v2224_v40  ;;  %998 = vmatprep.subr.bf16.mxu0 %v2253_v58  ;;  %v2301_v40 = vld [vmem:[%s3077_s7 + $0x44] ss:$16 sps:$4 sm:$0xff]   ;;  %v2347_v57 = vld [vmem:[%s3077_s7 + $0x140] ss:$16 sps:$4 sm:$0xff]  }
  0x35   : > { %v2355_v58 = vld [vmem:[%s3077_s7 + $0x164] ss:$16 sps:$4 sm:$0xff]  }
  0x37   : > { %764 = vmatpush1.bf16.msra.mxu1 %v2226_v41  ;;  %999 = vmatpush1.bf16.msra.mxu0 %v2251_v59  ;;  %v2299_v41 = vld [vmem:[%s3077_s7 + $0x40] ss:$16 sps:$4 sm:$0xff]  }
  0x38   : > { %765 = vmatprep.subr.bf16.mxu1 %v2227_v42  ;;  %1000 = vmatprep.subr.bf16.mxu0 %v2256_v60  ;;  %v2307_v42 = vld [vmem:[%s3077_s7 + $0x64] ss:$16 sps:$4 sm:$0xff]   ;;  %v2353_v59 = vld [vmem:[%s3077_s7 + $0x160] ss:$16 sps:$4 sm:$0xff]  }
  0x39   : > { %v2361_v60 = vld [vmem:[%s3077_s7 + $0x184] ss:$16 sps:$4 sm:$0xff]  }
  0x3b   : > { %766 = vmatpush1.bf16.msra.mxu1 %v2229_v43  ;;  %1001 = vmatpush1.bf16.msra.mxu0 %v2254_v61  ;;  %v2305_v43 = vld [vmem:[%s3077_s7 + $0x60] ss:$16 sps:$4 sm:$0xff]  }
  0x3c   : > { %767 = vmatprep.subr.bf16.mxu1 %v2230_v44  ;;  %1002 = vmatprep.subr.bf16.mxu0 %v2259_v62  ;;  %v2313_v44 = vld [vmem:[%s3077_s7 + $0x84] ss:$16 sps:$4 sm:$0xff]   ;;  %v2359_v61 = vld [vmem:[%s3077_s7 + $0x180] ss:$16 sps:$4 sm:$0xff]  }
  0x3d   : > { %v2367_v62 = vld [vmem:[%s3077_s7 + $0x1a4] ss:$16 sps:$4 sm:$0xff]  }
  0x3f   : > { %768 = vmatpush1.bf16.msra.mxu1 %v2232_v45  ;;  %1003 = vmatpush1.bf16.msra.mxu0 %v2257_v63  ;;  %v2311_v45 = vld [vmem:[%s3077_s7 + $0x80] ss:$16 sps:$4 sm:$0xff]  }
  0x40   : > { %769 = vmatprep.subr.bf16.mxu1 %v2233_v46  ;;  %1004 = vmatprep.subr.bf16.mxu0 %v2262_v0  ;;  %v2319_v46 = vld [vmem:[%s3077_s7 + $0xa4] ss:$16 sps:$4 sm:$0xff]   ;;  %v2365_v63 = vld [vmem:[%s3077_s7 + $0x1a0] ss:$16 sps:$4 sm:$0xff]  }
  0x41   : > { %v569_v0 = vld [vmem:[%s3074_s4] sm:$0x3] }
  0x43   : > { %770 = vmatpush1.bf16.msra.mxu1 %v2235_v47  ;;  %1005 = vmatpush1.bf16.msra.mxu0 %v2260_v1  ;;  %v2317_v47 = vld [vmem:[%s3077_s7 + $0xa0] ss:$16 sps:$4 sm:$0xff]   ;;  %v574_v1 = vrot.slane %v569_v0, %v2733_v16 }
  0x44   : > { %771 = vmatprep.subr.bf16.mxu1 %v2236_v48  ;;  %1006 = vmatprep.subr.bf16.mxu0 %v2265_v2  ;;  %v2325_v48 = vld [vmem:[%s3077_s7 + $0xc4] ss:$16 sps:$4 sm:$0xff]   ;;  %v578_v2 = vrot.slane %v569_v0, %v2739_v18 }
  0x47   : > { %772 = vmatpush1.bf16.msra.mxu1 %v2238_v49  ;;  %1007 = vmatpush1.bf16.msra.mxu0 %v2263_v3  ;;  %v2323_v49 = vld [vmem:[%s3077_s7 + $0xc0] ss:$16 sps:$4 sm:$0xff]  }
  0x48   : > { %1008 = vmatprep.subr.bf16.mxu0 %v2268_v4  ;;  %1441 = vmatprep.subr.bf16.mxu1 %v2289_v36  ;;  %v2350_v36 = vld [vmem:[%s3077_s7 + $0x148] ss:$16 sps:$4 sm:$0xff]  }
  0x4b   : > { %1009 = vmatpush1.bf16.msra.mxu0 %v2266_v5 }
  0x4c   : > { %1010 = vmatprep.subr.bf16.mxu0 %v2271_v6 }
  0x4f   : > { %1011 = vmatpush1.bf16.msra.mxu0 %v2269_v7 }
  0x50   : > { %1012 = vmatprep.subr.bf16.mxu0 %v2274_v8 }
  0x53   : > { %1013 = vmatpush1.bf16.msra.mxu0 %v2272_v9 }
  0x54   : > { %1014 = vmatprep.subr.bf16.mxu0 %v2277_v10 }
  0x57   : > { %1015 = vmatpush1.bf16.msra.mxu0 %v2275_v11 }
  0x58   : > { %1016 = vmatprep.subr.bf16.mxu0 %v2280_v12  ;;  %v2290_v12 = vld [vmem:[%s3077_s7 + $0x8] ss:$16 sps:$4 sm:$0xff]  }
  0x5b   : > { %1017 = vmatpush1.bf16.msra.mxu0 %v2278_v13 }
  0x5c   : > { %1018 = vmatprep.subr.bf16.mxu0 %v2283_v31  ;;  %v2340_v31 = vld [vmem:[%s3077_s7 + $0x10c] ss:$16 sps:$4 sm:$0xff]  }
  0x5f   : > { %1019 = vmatpush1.bf16.msra.mxu0 %v2281_v32  ;;  %v2338_v32 = vld [vmem:[%s3077_s7 + $0x108] ss:$16 sps:$4 sm:$0xff]  }
  0x60   : > { %1020 = vmatprep.subr.bf16.mxu0 %v2286_v33  ;;  %v2346_v33 = vld [vmem:[%s3077_s7 + $0x12c] ss:$16 sps:$4 sm:$0xff]  }
  0x63   : > { %1021 = vmatpush1.bf16.msra.mxu0 %v2284_v34  ;;  %v2344_v34 = vld [vmem:[%s3077_s7 + $0x128] ss:$16 sps:$4 sm:$0xff]  }
  0x64   : > { %1482 = vmatprep.subr.bf16.mxu0 %v2292_v37  ;;  %v2358_v37 = vld [vmem:[%s3077_s7 + $0x16c] ss:$16 sps:$4 sm:$0xff]  }
  0xf9   : > { %v526_v21 = vpop.f32.mrb[0].mxu0 }
  0xfa   : > { %v527_v22 = vadd.f32 %v526_v21, %v405_v19  ;;  %v528_v23 = vpop.f32.mrb[1].mxu0  ;;  %v2304_v19 = vld [vmem:[%s3077_s7 + $0x4c] ss:$16 sps:$4 sm:$0xff]  }
  0xfb   : > { %v529_v24 = vadd.f32 %v528_v23, %v409_v20  ;;  %v530_v25 = vpop.f32.mrb[2].mxu0  ;;  %v2302_v20 = vld [vmem:[%s3077_s7 + $0x48] ss:$16 sps:$4 sm:$0xff]   ;;  %v2310_v21 = vld [vmem:[%s3077_s7 + $0x6c] ss:$16 sps:$4 sm:$0xff]  }
  0xfc   : > { %v533_v26 = vmax.f32 %v527_v22, 0.0  ;;  %v531_v27 = vpop.f32.mrb[3].mxu0  ;;  %v2308_v22 = vld [vmem:[%s3077_s7 + $0x68] ss:$16 sps:$4 sm:$0xff]   ;;  %v2316_v23 = vld [vmem:[%s3077_s7 + $0x8c] ss:$16 sps:$4 sm:$0xff]  }
  0xfd   : > { %v534_v28 = vmax.f32 %v529_v24, 0.0  ;;  %v2314_v24 = vld [vmem:[%s3077_s7 + $0x88] ss:$16 sps:$4 sm:$0xff]   ;;  %v2322_v25 = vld [vmem:[%s3077_s7 + $0xac] ss:$16 sps:$4 sm:$0xff]  }
  0xfe   : > { %v535_v30 = vpack.c.bf16 %v533_v26, %v533_v26  ;;  %v2320_v26 = vld [vmem:[%s3077_s7 + $0xa8] ss:$16 sps:$4 sm:$0xff]   ;;  %v2328_v27 = vld [vmem:[%s3077_s7 + $0xcc] ss:$16 sps:$4 sm:$0xff]  }
  0xff   : > { %v536_v29 = vpack.c.bf16 %v534_v28, %v534_v28  ;;  %v2326_v28 = vld [vmem:[%s3077_s7 + $0xc8] ss:$16 sps:$4 sm:$0xff]  }
 0x101   : > { %773 = vmatprep.mubr.bf16.mxu1 %v536_v29  ;;  %v2334_v29 = vld [vmem:[%s3077_s7 + $0xec] ss:$16 sps:$4 sm:$0xff]  }
 0x102   : > { %774 = vmatmul.mubr.bf16.vlgmr.msra.gmra.mrb[0].mxu1 %v535_v30  ;;  %v2332_v30 = vld [vmem:[%s3077_s7 + $0xe8] ss:$16 sps:$4 sm:$0xff]  }
 0x103   : > { %1442 = vmatpush1.bf16.msra.mxu1 %v2287_v35  ;;  %v2352_v35 = vld [vmem:[%s3077_s7 + $0x14c] ss:$16 sps:$4 sm:$0xff]  }
 0x104   : > { %1443 = vmatprep.subr.bf16.mxu1 %v2295_v38  ;;  %v2356_v38 = vld [vmem:[%s3077_s7 + $0x168] ss:$16 sps:$4 sm:$0xff]  }
 0x107   : > { %1444 = vmatpush1.bf16.msra.mxu1 %v2293_v39  ;;  %v2364_v39 = vld [vmem:[%s3077_s7 + $0x18c] ss:$16 sps:$4 sm:$0xff]  }
 0x108   : > { %1445 = vmatprep.subr.bf16.mxu1 %v2301_v40  ;;  %v2362_v40 = vld [vmem:[%s3077_s7 + $0x188] ss:$16 sps:$4 sm:$0xff]  }
 0x10b   : > { %1446 = vmatpush1.bf16.msra.mxu1 %v2299_v41  ;;  %v2370_v41 = vld [vmem:[%s3077_s7 + $0x1ac] ss:$16 sps:$4 sm:$0xff]  }
 0x10c   : > { %1447 = vmatprep.subr.bf16.mxu1 %v2307_v42  ;;  %v2368_v42 = vld [vmem:[%s3077_s7 + $0x1a8] ss:$16 sps:$4 sm:$0xff]  }
 0x10f   : > { %1448 = vmatpush1.bf16.msra.mxu1 %v2305_v43  ;;  %v2373_v43 = vld [vmem:[%s3077_s7 + $0x1c4] ss:$16 sps:$4 sm:$0xff]  }
 0x110   : > { %1449 = vmatprep.subr.bf16.mxu1 %v2313_v44  ;;  %v2376_v44 = vld [vmem:[%s3077_s7 + $0x1cc] ss:$16 sps:$4 sm:$0xff]  }
 0x113   : > { %1450 = vmatpush1.bf16.msra.mxu1 %v2311_v45  ;;  %v2371_v45 = vld [vmem:[%s3077_s7 + $0x1c0] ss:$16 sps:$4 sm:$0xff]  }
 0x114   : > { %1451 = vmatprep.subr.bf16.mxu1 %v2319_v46  ;;  %v2374_v46 = vld [vmem:[%s3077_s7 + $0x1c8] ss:$16 sps:$4 sm:$0xff]  }
 0x117   : > { %1452 = vmatpush1.bf16.msra.mxu1 %v2317_v47  ;;  %v2379_v47 = vld [vmem:[%s3077_s7 + $0x1e4] ss:$16 sps:$4 sm:$0xff]  }
 0x118   : > { %1453 = vmatprep.subr.bf16.mxu1 %v2325_v48  ;;  %v2382_v48 = vld [vmem:[%s3077_s7 + $0x1ec] ss:$16 sps:$4 sm:$0xff]  }
 0x11b   : > { %1454 = vmatpush1.bf16.msra.mxu1 %v2323_v49  ;;  %v2377_v49 = vld [vmem:[%s3077_s7 + $0x1e0] ss:$16 sps:$4 sm:$0xff]  }
 0x11c   : > { %1455 = vmatprep.subr.bf16.mxu1 %v2331_v50  ;;  %v2380_v50 = vld [vmem:[%s3077_s7 + $0x1e8] ss:$16 sps:$4 sm:$0xff]  }
 0x11f   : > { %1456 = vmatpush1.bf16.msra.mxu1 %v2329_v51  ;;  %v2383_v51 = vld [vmem:[%s3079_s9 + $0x40] sm:$0xff]  }
 0x120   : > { %1457 = vmatprep.subr.bf16.mxu1 %v2337_v52  ;;  %v2384_v52 = vld [vmem:[%s3079_s9 + $0xc0] sm:$0xff]  }
 0x123   : > { %1458 = vmatpush1.bf16.msra.mxu1 %v2335_v53  ;;  %v818_v53 = vld [vmem:[%s3076_s6] sm:$0x3] }
 0x124   : > { %1459 = vmatprep.subr.bf16.mxu1 %v2343_v54  ;;  %v823_v54 = vrot.slane %v818_v53, %v2733_v16 }
 0x127   : > { %1460 = vmatpush1.bf16.msra.mxu1 %v2341_v55  ;;  %v827_v55 = vrot.slane %v818_v53, %v2739_v18 }
 0x128   : > { %1461 = vmatprep.subr.bf16.mxu1 %v2349_v56 }
 0x12b   : > { %1462 = vmatpush1.bf16.msra.mxu1 %v2347_v57 }
 0x12c   : > { %1463 = vmatprep.subr.bf16.mxu1 %v2355_v58 }
 0x12f   : > { %1464 = vmatpush1.bf16.msra.mxu1 %v2353_v59 }
 0x130   : > { %1465 = vmatprep.subr.bf16.mxu1 %v2361_v60 }
 0x133   : > { %1466 = vmatpush1.bf16.msra.mxu1 %v2359_v61 }
 0x134   : > { %1467 = vmatprep.subr.bf16.mxu1 %v2367_v62 }
 0x137   : > { %1468 = vmatpush1.bf16.msra.mxu1 %v2365_v63 }
 0x138   : > { %1469 = vmatprep.subr.bf16.mxu1 %v2373_v43 }
 0x13b   : > { %1470 = vmatpush1.bf16.msra.mxu1 %v2371_v45 }
 0x13c   : > { %1471 = vmatprep.subr.bf16.mxu1 %v2379_v47 }
 0x13f   : > { %1472 = vmatpush1.bf16.msra.mxu1 %v2377_v49 }
 0x140   : > { %2114 = vmatprep.subr.bf16.mxu1 %v2383_v51 }
 0x1d5   : > { %v775_v3 = vpop.f32.mrb[0].mxu1 }
 0x1d6   : > { %v776_v4 = vadd.f32 %v775_v3, %v574_v1  ;;  %v777_v5 = vpop.f32.mrb[1].mxu1  ;;  %v2385_v1 = vld [vmem:[%s3079_s9] sm:$0xff]  }
 0x1d7   : > { %v778_v6 = vadd.f32 %v777_v5, %v578_v2  ;;  %v779_v7 = vpop.f32.mrb[2].mxu1  ;;  %v2386_v2 = vld [vmem:[%s3079_s9 + $0x80] sm:$0xff]   ;;  %v2388_v5 = vld [vmem:[%s3079_s9 + $0xc8] sm:$0xff]  }
 0x1d8   : > { %v782_v8 = vmax.f32 %v776_v4, 0.0  ;;  %v780_v9 = vpop.f32.mrb[3].mxu1  ;;  %v2387_v4 = vld [vmem:[%s3079_s9 + $0x48] sm:$0xff]  }
 0x1d9   : > { %v783_v10 = vmax.f32 %v778_v6, 0.0  ;;  %v2389_v6 = vld [vmem:[%s3079_s9 + $0x8] sm:$0xff]   ;;  %v2392_v9 = vld [vmem:[%s3079_s9 + $0xd0] sm:$0xff]  }
 0x1da   : > { %v784_v13 = vpack.c.bf16 %v782_v8, %v782_v8  ;;  %v2390_v7 = vld [vmem:[%s3079_s9 + $0x88] sm:$0xff]   ;;  %v2391_v8 = vld [vmem:[%s3079_s9 + $0x50] sm:$0xff]  }
 0x1db   : > { %v785_v11 = vpack.c.bf16 %v783_v10, %v783_v10  ;;  %v2393_v10 = vld [vmem:[%s3079_s9 + $0x10] sm:$0xff]  }
 0x1dd   : > { %1022 = vmatprep.mubr.bf16.mxu0 %v785_v11  ;;  %v2394_v11 = vld [vmem:[%s3079_s9 + $0x90] sm:$0xff]  }
 0x1de   : > { %1023 = vmatmul.mubr.bf16.vlgmr.msra.gmra.mrb[4].mxu0 %v784_v13  ;;  %v2396_v13 = vld [vmem:[%s3079_s9 + $0xd8] sm:$0xff]  }
 0x1df   : > { %1483 = vmatpush1.bf16.msra.mxu0 %v2290_v12  ;;  %v2395_v12 = vld [vmem:[%s3079_s9 + $0x58] sm:$0xff]  }
 0x1e0   : > { %1484 = vmatprep.subr.bf16.mxu0 %v2298_v14  ;;  %v2397_v14 = vld [vmem:[%s3079_s9 + $0x18] sm:$0xff]  }
 0x1e3   : > { %1485 = vmatpush1.bf16.msra.mxu0 %v2296_v17  ;;  %v2398_v17 = vld [vmem:[%s3079_s9 + $0x98] sm:$0xff]  }
 0x1e4   : > { %1486 = vmatprep.subr.bf16.mxu0 %v2304_v19  ;;  %v2399_v19 = vld [vmem:[%s3079_s9 + $0x60] sm:$0xff]  }
 0x1e7   : > { %1487 = vmatpush1.bf16.msra.mxu0 %v2302_v20  ;;  %v2400_v20 = vld [vmem:[%s3079_s9 + $0xe0] sm:$0xff]  }
 0x1e8   : > { %1488 = vmatprep.subr.bf16.mxu0 %v2310_v21  ;;  %v2401_v21 = vld [vmem:[%s3079_s9 + $0x20] sm:$0xff]  }
 0x1eb   : > { %1489 = vmatpush1.bf16.msra.mxu0 %v2308_v22  ;;  %v2402_v22 = vld [vmem:[%s3079_s9 + $0xa0] sm:$0xff]  }
 0x1ec   : > { %1490 = vmatprep.subr.bf16.mxu0 %v2316_v23  ;;  %v2403_v23 = vld [vmem:[%s3079_s9 + $0x68] sm:$0xff]  }
 0x1ef   : > { %1491 = vmatpush1.bf16.msra.mxu0 %v2314_v24  ;;  %v2404_v24 = vld [vmem:[%s3079_s9 + $0xe8] sm:$0xff]  }
 0x1f0   : > { %1492 = vmatprep.subr.bf16.mxu0 %v2322_v25  ;;  %v2405_v25 = vld [vmem:[%s3079_s9 + $0x28] sm:$0xff]  }
 0x1f3   : > { %1493 = vmatpush1.bf16.msra.mxu0 %v2320_v26  ;;  %v2406_v26 = vld [vmem:[%s3079_s9 + $0xa8] sm:$0xff]  }
 0x1f4   : > { %1494 = vmatprep.subr.bf16.mxu0 %v2328_v27  ;;  %v2407_v27 = vld [vmem:[%s3079_s9 + $0x70] sm:$0xff]  }
 0x1f7   : > { %1495 = vmatpush1.bf16.msra.mxu0 %v2326_v28  ;;  %v2408_v28 = vld [vmem:[%s3079_s9 + $0xf0] sm:$0xff]  }
 0x1f8   : > { %1496 = vmatprep.subr.bf16.mxu0 %v2334_v29  ;;  %v2409_v29 = vld [vmem:[%s3079_s9 + $0x30] sm:$0xff]  }
 0x1fb   : > { %1497 = vmatpush1.bf16.msra.mxu0 %v2332_v30  ;;  %v2410_v30 = vld [vmem:[%s3079_s9 + $0xb0] sm:$0xff]  }
 0x1fc   : > { %1498 = vmatprep.subr.bf16.mxu0 %v2340_v31  ;;  %v2411_v31 = vld [vmem:[%s3079_s9 + $0x78] sm:$0xff]  }
 0x1ff   : > { %1499 = vmatpush1.bf16.msra.mxu0 %v2338_v32  ;;  %v2412_v32 = vld [vmem:[%s3079_s9 + $0xf8] sm:$0xff]  }
 0x200   : > { %1500 = vmatprep.subr.bf16.mxu0 %v2346_v33  ;;  %v2413_v33 = vld [vmem:[%s3079_s9 + $0x38] sm:$0xff]  }
 0x203   : > { %1501 = vmatpush1.bf16.msra.mxu0 %v2344_v34  ;;  %v2414_v34 = vld [vmem:[%s3079_s9 + $0xb8] sm:$0xff]  }
 0x204   : > { %1502 = vmatprep.subr.bf16.mxu0 %v2352_v35  ;;  %v1111_v35 = vsub.s32 2, %v2730_v15 }
 0x207   : > { %1503 = vmatpush1.bf16.msra.mxu0 %v2350_v36  ;;  %v1099_v36 = vld [vmem:[%s3078_s8] sm:$0xf] }
 0x208   : > { %1504 = vmatprep.subr.bf16.mxu0 %v2358_v37  ;;  %v1115_v37 = vsub.s32 3, %v2730_v15 }
 0x20b   : > { %1505 = vmatpush1.bf16.msra.mxu0 %v2356_v38  ;;  %v1104_v38 = vrot.slane %v1099_v36, %v2733_v16 }
 0x20c   : > { %1506 = vmatprep.subr.bf16.mxu0 %v2364_v39  ;;  %v1112_v39 = vrot.slane %v1099_v36, %v1111_v35 }
 0x20f   : > { %1507 = vmatpush1.bf16.msra.mxu0 %v2362_v40  ;;  %v1108_v40 = vrot.slane %v1099_v36, %v2739_v18 }
 0x210   : > { %1508 = vmatprep.subr.bf16.mxu0 %v2370_v41  ;;  %v1116_v41 = vrot.slane %v1099_v36, %v1115_v37 }
 0x213   : > { %1509 = vmatpush1.bf16.msra.mxu0 %v2368_v42 }
 0x214   : > { %1510 = vmatprep.subr.bf16.mxu0 %v2376_v44 }
 0x217   : > { %1511 = vmatpush1.bf16.msra.mxu0 %v2374_v46 }
 0x218   : > { %1512 = vmatprep.subr.bf16.mxu0 %v2382_v48 }
 0x21b   : > { %1513 = vmatpush1.bf16.msra.mxu0 %v2380_v50 }
 0x21c   : > { %2136 = vmatprep.subr.bf16.mxu0 %v2384_v52 }
 0x2b1   : > { %v1024_v56 = vpop.f32.mrb[4].mxu0 }
 0x2b2   : > { %v1025_v57 = vadd.f32 %v1024_v56, %v823_v54  ;;  %v1026_v58 = vpop.f32.mrb[5].mxu0 }
 0x2b3   : > { %v1027_v59 = vadd.f32 %v1026_v58, %v827_v55  ;;  %v1028_v60 = vpop.f32.mrb[6].mxu0 }
 0x2b4   : > { %v1031_v61 = vmax.f32 %v1025_v57, 0.0  ;;  %v1029_v62 = vpop.f32.mrb[7].mxu0 }
 0x2b5   : > { %v1032_v63 = vmax.f32 %v1027_v59, 0.0 }
 0x2b6   : > { %v1033_v3 = vpack.c.bf16 %v1031_v61, %v1031_v61  ;;  %v2079_v61 = vld [vmem:[%s3080_s10] ss:$0 sm:$0xff] }
 0x2b7   : > { %v1034_v0 = vpack.c.bf16 %v1032_v63, %v1032_v63 }
 0x2b9   : > { %1473 = vmatprep.mubr.bf16.mxu1 %v1034_v0  ;;  %1514 = vmatprep.mubr.bf16.mxu0 %v1034_v0 }
 0x2ba   : > { %1474 = vmatmul.mubr.bf16.vlgmr.msra.gmra.mrb[4].mxu1 %v1033_v3  ;;  %1515 = vmatmul.mubr.bf16.vlgmr.msra.gmra.mrb[8].mxu0 %v1033_v3 }
 0x2bb   : > { %2115 = vmatpush3.bf16.msra.mxu1 %v2385_v1  ;;  %2137 = vmatpush3.bf16.msra.mxu0 %v2386_v2 }
 0x2bc   : > { %2116 = vmatprep.subr.bf16.mxu1 %v2387_v4  ;;  %2138 = vmatprep.subr.bf16.mxu0 %v2388_v5 }
 0x2bf   : > { %2117 = vmatpush3.bf16.msra.mxu1 %v2389_v6  ;;  %2139 = vmatpush3.bf16.msra.mxu0 %v2390_v7 }
 0x2c0   : > { %2118 = vmatprep.subr.bf16.mxu1 %v2391_v8  ;;  %2140 = vmatprep.subr.bf16.mxu0 %v2392_v9 }
 0x2c3   : > { %2119 = vmatpush3.bf16.msra.mxu1 %v2393_v10  ;;  %2141 = vmatpush3.bf16.msra.mxu0 %v2394_v11 }
 0x2c4   : > { %2120 = vmatprep.subr.bf16.mxu1 %v2395_v12  ;;  %2142 = vmatprep.subr.bf16.mxu0 %v2396_v13 }
 0x2c7   : > { %2121 = vmatpush3.bf16.msra.mxu1 %v2397_v14  ;;  %2143 = vmatpush3.bf16.msra.mxu0 %v2398_v17 }
 0x2c8   : > { %2122 = vmatprep.subr.bf16.mxu1 %v2399_v19  ;;  %2144 = vmatprep.subr.bf16.mxu0 %v2400_v20 }
 0x2cb   : > { %2123 = vmatpush3.bf16.msra.mxu1 %v2401_v21  ;;  %2145 = vmatpush3.bf16.msra.mxu0 %v2402_v22 }
 0x2cc   : > { %2124 = vmatprep.subr.bf16.mxu1 %v2403_v23  ;;  %2146 = vmatprep.subr.bf16.mxu0 %v2404_v24 }
 0x2cf   : > { %2125 = vmatpush3.bf16.msra.mxu1 %v2405_v25  ;;  %2147 = vmatpush3.bf16.msra.mxu0 %v2406_v26 }
 0x2d0   : > { %2126 = vmatprep.subr.bf16.mxu1 %v2407_v27  ;;  %2148 = vmatprep.subr.bf16.mxu0 %v2408_v28 }
 0x2d3   : > { %2127 = vmatpush3.bf16.msra.mxu1 %v2409_v29  ;;  %2149 = vmatpush3.bf16.msra.mxu0 %v2410_v30 }
 0x2d4   : > { %2128 = vmatprep.subr.bf16.mxu1 %v2411_v31  ;;  %2150 = vmatprep.subr.bf16.mxu0 %v2412_v32 }
 0x2d7   : > { %2129 = vmatpush3.bf16.msra.mxu1 %v2413_v33  ;;  %2151 = vmatpush3.bf16.msra.mxu0 %v2414_v34 }
 0x38d   : > { %v1475_v42 = vpop.f32.mrb[4].mxu1  ;;  %v1516_v43 = vpop.f32.mrb[8].mxu0 }
 0x38e   : > { %v1476_v44 = vadd.f32 %v1475_v42, %v1104_v38  ;;  %v1517_v45 = vadd.f32 %v1516_v43, %v1112_v39  ;;  %v1477_v46 = vpop.f32.mrb[5].mxu1  ;;  %v1518_v47 = vpop.f32.mrb[9].mxu0 }
 0x38f   : > { %v1478_v48 = vadd.f32 %v1477_v46, %v1108_v40  ;;  %v1519_v49 = vadd.f32 %v1518_v47, %v1116_v41  ;;  %v1479_v50 = vpop.f32.mrb[6].mxu1  ;;  %v1520_v51 = vpop.f32.mrb[10].mxu0 }
 0x390   : > { %v1523_v52 = vmax.f32 %v1476_v44, 0.0  ;;  %v1525_v53 = vmax.f32 %v1517_v45, 0.0  ;;  %v1480_v54 = vpop.f32.mrb[7].mxu1  ;;  %v1521_v15 = vpop.f32.mrb[11].mxu0 }
 0x391   : > { %v1524_v55 = vmax.f32 %v1478_v48, 0.0  ;;  %v1526_v16 = vmax.f32 %v1519_v49, 0.0 }
 0x392   : > { %v1527_v57 = vpack.c.bf16 %v1523_v52, %v1523_v52  ;;  %v1529_v58 = vpack.c.bf16 %v1525_v53, %v1525_v53 }
 0x393   : > { %v1528_v56 = vpack.c.bf16 %v1524_v55, %v1524_v55  ;;  %v1530_v18 = vpack.c.bf16 %v1526_v16, %v1526_v16 }
 0x395   : > { %1826 = vmatprep.mubr.bf16.mxu1 %v1528_v56  ;;  %1866 = vmatprep.mubr.bf16.mxu0 %v1530_v18 }
 0x396   : > { %1827 = vmatmul.mubr.bf16.vlgmr.msra.gmra.mrb[8].mxu1 %v1527_v57  ;;  %1867 = vmatmul.mubr.bf16.vlgmr.msra.gmra.mrb[12].mxu0 %v1529_v58 }
 0x469   : > { %v2130_v59 = vpop.f32.mrb[8].mxu1  ;;  %v2152_v60 = vpop.f32.mrb[12].mxu0 }
 0x46a   : > { %v2131_v62 = vpop.f32.mrb[9].mxu1  ;;  %v2153_v63 = vpop.f32.mrb[13].mxu0 }
 0x46b   : > { %v2132_v0 = vadd.f32 %v2131_v62, %v2130_v59  ;;  %v2154_v1 = vadd.f32 %v2153_v63, %v2152_v60  ;;  %v2133_v2 = vpop.f32.mrb[10].mxu1  ;;  %v2155_v3 = vpop.f32.mrb[14].mxu0 }
 0x46c   : > { %v2134_v4 = vpop.f32.mrb[11].mxu1  ;;  %v2156_v5 = vpop.f32.mrb[15].mxu0 }
 0x46d   : > { %v1829_v6 = vadd.f32 %v2132_v0, %v2079_v61 }
 0x46f   : > { %v1869_v7 = vadd.f32 %v2154_v1, %v1829_v6 }
 0x471   : > { %1874 = vst [vmem:[%s381_s12] sm:$0xff] %v1869_v7 }
 0x472 PF: > { %s21_s17 = sadd.s32 1, %s2421_s17  }
 0x473   : > { %p18_p4 = scmp.ge.s32.totalorder %s21_s17, 4  }
 0x475   :  { %20 = sbr.rel (!%p18_p4) target bundleno = 1 (0x1), region = 94 }

</bundles_post_ra>
